<compile_context>
chip_gen: v6e
topology: v6e:2x2x1
jax: 0.10.0
libtpu: 0.0.40
codegen_flags: <defaults>
</compile_context>

<pallas_src>
import jax
import jax.numpy as jnp
from jax.experimental import pallas as pl
from jax.experimental.pallas import tpu as pltpu

T_DIM = 1024      # module's self.t_dim
EF_DIM = 128      # module's self.ef_dim
N4 = 4 * EF_DIM   # Linear output width (512)


def ca_net_kernel(x_ref, w_ref, b_ref, eps_ref, out_ref):
    # Linear: (TM, t_dim) @ (t_dim, 4*ef_dim) + bias  -> MXU (bf16 inputs, f32 acc)
    x = x_ref[...].astype(jnp.bfloat16)
    y = jnp.dot(x, w_ref[...], preferred_element_type=jnp.float32)
    y = y + b_ref[...]                      # b_ref is (1, 4*ef_dim), broadcasts over rows

    # GLU over the feature (channel) dim — all splits land on 128-lane boundaries.
    half = 2 * EF_DIM
    h = y[:, :half] * jax.nn.sigmoid(y[:, half:])

    mu = h[:, :EF_DIM]
    logvar = h[:, EF_DIM:]

    # reparametrize: c = eps * exp(0.5*logvar) + mu
    std = jnp.exp(0.5 * logvar)
    c = eps_ref[...] * std + mu

    # single lane-dense writeback: [c | mu | logvar] -> (TM, 3*EF_DIM)
    out_ref[...] = jnp.concatenate([c, mu, logvar], axis=-1).astype(out_ref.dtype)


def ca_net_forward(text_embedding, weight_t, bias, eps):
    """text_embedding: (B, T_DIM) f32; weight_t: (T_DIM, 4*EF_DIM) f32 (cast to bf16
    for streaming); bias: (4*EF_DIM,) f32; eps: (B, EF_DIM) f32.
    Returns (c_code, mu, logvar), each (B, EF_DIM) f32."""
    B = text_embedding.shape[0]
    w_bf16 = weight_t.astype(jnp.bfloat16)   # halve the dominant HBM transfer
    bias2d = bias.reshape(1, N4)

    # Small batch: one grid point, everything VMEM-resident. Large batch: tile M with
    # 256-row blocks (parallel -> both v7x cores); weight block index stays (0, 0) so
    # it is fetched once and kept resident across the grid.
    TM = B if B <= 256 else 256
    grid = (pl.cdiv(B, TM),)

    out = pl.pallas_call(
        ca_net_kernel,
        out_shape=jax.ShapeDtypeStruct((B, 3 * EF_DIM), jnp.float32),
        grid=grid,
        in_specs=[
            pl.BlockSpec((TM, T_DIM), lambda i: (i, 0)),       # x tile
            pl.BlockSpec((T_DIM, N4), lambda i: (0, 0)),       # weight, VMEM-resident
            pl.BlockSpec((1, N4), lambda i: (0, 0)),           # bias
            pl.BlockSpec((TM, EF_DIM), lambda i: (i, 0)),      # eps tile
        ],
        out_specs=pl.BlockSpec((TM, 3 * EF_DIM), lambda i: (i, 0)),
        compiler_params=pltpu.CompilerParams(
            dimension_semantics=("parallel",)),
        cost_estimate=pl.CostEstimate(
            flops=2 * B * T_DIM * N4,
            transcendentals=3 * B * EF_DIM,          # sigmoid (2*EF) + exp (EF) per row
            bytes_accessed=(T_DIM * N4 * 2            # bf16 weight
                            + B * T_DIM * 4           # x
                            + N4 * 4                  # bias
                            + B * EF_DIM * 4          # eps
                            + B * 3 * EF_DIM * 4)),   # merged output
    )(text_embedding, w_bf16, bias2d, eps)

    c_code = out[:, :EF_DIM]
    mu = out[:, EF_DIM:2 * EF_DIM]
    logvar = out[:, 2 * EF_DIM:]
    return c_code, mu, logvar


def _reference(text_embedding, weight_t, bias, eps):
    # Same bf16 quantization of the matmul inputs as the kernel, f32 accumulation.
    x = text_embedding.astype(jnp.bfloat16)
    w = weight_t.astype(jnp.bfloat16)
    y = jnp.dot(x, w, preferred_element_type=jnp.float32) + bias
    half = 2 * EF_DIM
    h = y[:, :half] * jax.nn.sigmoid(y[:, half:])
    mu = h[:, :EF_DIM]
    logvar = h[:, EF_DIM:]
    c = eps * jnp.exp(0.5 * logvar) + mu
    return c, mu, logvar


if __name__ == "__main__":
    key = jax.random.PRNGKey(0)
    k_x, k_w, k_b, k_eps = jax.random.split(key, 4)

    B = 8  # small batch

    # Deterministic parameter init (PyTorch Linear-style uniform bounds).
    bound = 1.0 / (T_DIM ** 0.5)
    weight_t = jax.random.uniform(k_w, (T_DIM, N4), jnp.float32,
                                  minval=-bound, maxval=bound)
    bias = jax.random.uniform(k_b, (N4,), jnp.float32,
                              minval=-bound, maxval=bound)

    text_embedding = jax.random.normal(k_x, (B, T_DIM), jnp.float32)
    # eps in PyTorch is torch.FloatTensor(...).normal_(); here drawn deterministically.
    eps = jax.random.normal(k_eps, (B, EF_DIM), jnp.float32)

    c_code, mu, logvar = ca_net_forward(text_embedding, weight_t, bias, eps)
    jax.block_until_ready((c_code, mu, logvar))

    c_ref, mu_ref, lv_ref = _reference(text_embedding, weight_t, bias, eps)
    assert jnp.allclose(c_code, c_ref, atol=1e-3, rtol=1e-3)
    assert jnp.allclose(mu, mu_ref, atol=1e-3, rtol=1e-3)
    assert jnp.allclose(logvar, lv_ref, atol=1e-3, rtol=1e-3)

    print("KERNEL_OK")
</pallas_src>

<mosaic_0001>
module attributes {stable_mosaic.version = 11 : i64} {
  func.func @ca_net_kernel(%arg0: i32, %arg1: memref<8x1024xf32, #tpu.memory_space<vmem>>, %arg2: memref<1024x512xbf16, #tpu.memory_space<vmem>>, %arg3: memref<1x512xf32, #tpu.memory_space<vmem>>, %arg4: memref<8x128xf32, #tpu.memory_space<vmem>>, %arg5: memref<8x384xf32, #tpu.memory_space<vmem>>) attributes {dimension_semantics = [#tpu.dimension_semantics<parallel>], iteration_bounds = array<i64: 1>, scalar_prefetch = 0 : i64, scratch_operands = 0 : i64, tpu.core_type = #tpu.core_type<tc>, window_params = [{transform_indices = @transform_0, window_bounds = array<i64: 8, 1024>}, {pipeline_mode = #tpu.pipeline_mode<synchronous>, transform_indices = @transform_1, window_bounds = array<i64: 1024, 512>}, {pipeline_mode = #tpu.pipeline_mode<synchronous>, transform_indices = @transform_2, window_bounds = array<i64: 1, 512>}, {transform_indices = @transform_3, window_bounds = array<i64: 8, 128>}, {transform_indices = @transform_4, window_bounds = array<i64: 8, 384>}]} {
    %c0 = arith.constant 0 : index
    %c0_0 = arith.constant 0 : index
    %0 = vector.load %arg1[%c0, %c0_0] : memref<8x1024xf32, #tpu.memory_space<vmem>>, vector<8x1024xf32>
    %1 = arith.truncf %0 : vector<8x1024xf32> to vector<8x1024xbf16>
    %c0_1 = arith.constant 0 : index
    %c0_2 = arith.constant 0 : index
    %2 = vector.load %arg2[%c0_1, %c0_2] : memref<1024x512xbf16, #tpu.memory_space<vmem>>, vector<1024x512xbf16>
    %cst = arith.constant dense<0.000000e+00> : vector<8x512xf32>
    %3 = tpu.matmul %1, %2, %cst {dimension_numbers = #tpu.dot_dimension_numbers<[1], [0], [0], [1], [0, 0, 1, 1], [], []>} : vector<8x1024xbf16>, vector<1024x512xbf16>, vector<8x512xf32> -> vector<8x512xf32>
    %c0_3 = arith.constant 0 : index
    %c0_4 = arith.constant 0 : index
    %4 = vector.load %arg3[%c0_3, %c0_4] : memref<1x512xf32, #tpu.memory_space<vmem>>, vector<1x512xf32>
    %5 = vector.broadcast %4 : vector<1x512xf32> to vector<8x512xf32>
    %6 = arith.addf %3, %5 : vector<8x512xf32>
    %7 = vector.extract_strided_slice %6 {offsets = [0, 0], sizes = [8, 256], strides = [1, 1]} : vector<8x512xf32> to vector<8x256xf32>
    %8 = vector.extract_strided_slice %6 {offsets = [0, 256], sizes = [8, 256], strides = [1, 1]} : vector<8x512xf32> to vector<8x256xf32>
    %9 = arith.negf %8 : vector<8x256xf32>
    %10 = math.exp %9 : vector<8x256xf32>
    %cst_5 = arith.constant 1.000000e+00 : f32
    %11 = vector.broadcast %cst_5 : f32 to vector<8x256xf32>
    %12 = arith.addf %11, %10 : vector<8x256xf32>
    %13 = arith.divf %11, %12 : vector<8x256xf32>
    %14 = arith.mulf %7, %13 : vector<8x256xf32>
    %15 = vector.extract_strided_slice %14 {offsets = [0, 0], sizes = [8, 128], strides = [1, 1]} : vector<8x256xf32> to vector<8x128xf32>
    %16 = vector.extract_strided_slice %14 {offsets = [0, 128], sizes = [8, 128], strides = [1, 1]} : vector<8x256xf32> to vector<8x128xf32>
    %cst_6 = arith.constant 5.000000e-01 : f32
    %17 = vector.broadcast %cst_6 : f32 to vector<8x128xf32>
    %18 = arith.mulf %17, %16 : vector<8x128xf32>
    %19 = math.exp %18 : vector<8x128xf32>
    %c0_7 = arith.constant 0 : index
    %c0_8 = arith.constant 0 : index
    %20 = vector.load %arg4[%c0_7, %c0_8] : memref<8x128xf32, #tpu.memory_space<vmem>>, vector<8x128xf32>
    %21 = arith.mulf %20, %19 : vector<8x128xf32>
    %22 = arith.addf %21, %15 : vector<8x128xf32>
    %23 = tpu.concatenate %22, %15, %16 in 1 : vector<8x128xf32>, vector<8x128xf32>, vector<8x128xf32> -> vector<8x384xf32>
    %c0_9 = arith.constant 0 : index
    %c0_10 = arith.constant 0 : index
    %24 = vector.load %arg5[%c0_9, %c0_10] : memref<8x384xf32, #tpu.memory_space<vmem>>, vector<8x384xf32>
    tpu.vector_store %arg5[%c0_9, %c0_10], %23 {strides = array<i32>} : memref<8x384xf32, #tpu.memory_space<vmem>>, vector<8x384xf32>,
    return
  }
  func.func @transform_0(%arg0: i32) -> (i32, i32) {
    %c0_i32 = arith.constant 0 : i32
    %c0_i32_0 = arith.constant 0 : i32
    return %arg0, %c0_i32 : i32, i32
  }
  func.func @transform_1(%arg0: i32) -> (i32, i32) {
    %c0_i32 = arith.constant 0 : i32
    %c0_i32_0 = arith.constant 0 : i32
    %c0_i32_1 = arith.constant 0 : i32
    return %c0_i32, %c0_i32_0 : i32, i32
  }
  func.func @transform_2(%arg0: i32) -> (i32, i32) {
    %c0_i32 = arith.constant 0 : i32
    %c0_i32_0 = arith.constant 0 : i32
    %c0_i32_1 = arith.constant 0 : i32
    return %c0_i32, %c0_i32_0 : i32, i32
  }
  func.func @transform_3(%arg0: i32) -> (i32, i32) {
    %c0_i32 = arith.constant 0 : i32
    %c0_i32_0 = arith.constant 0 : i32
    return %arg0, %c0_i32 : i32, i32
  }
  func.func @transform_4(%arg0: i32) -> (i32, i32) {
    %c0_i32 = arith.constant 0 : i32
    %c0_i32_0 = arith.constant 0 : i32
    return %arg0, %c0_i32 : i32, i32
  }
}

</mosaic_0001>

<bundles_post_ra>
// kernel: tpu_custom_call.1
= control target key start
LH: loop header
LB: loop body
LE: loop exit
PB: predicated region body
PF: predicated region fallthrough
CT: control target
= control target key end

     0   :  { %9 = vsyncpa [#allocation3], 0  ;;  %s2855_s0 = inlined_call_operand.hbm [shape: f32[8,1024], index: 0, kind: input, shape index: {}]   ;;  %s2856_s1 = inlined_call_operand.hbm [shape: bf16[1024,512], index: 1, kind: input, shape index: {}]   ;;  %s2857_s2 = inlined_call_operand.hbm [shape: f32[1,512], index: 2, kind: input, shape index: {}]   ;;  %s2858_s3 = inlined_call_operand.hbm [shape: f32[8,128], index: 3, kind: input, shape index: {}]   ;;  %s2859_s4 = inlined_call_operand.hbm [shape: f32[8,384], index: 4, kind: output, shape index: {}]  }
   0x1   :  { %10 = vsyncpa [#allocation6], 0 }
   0x2   :  { %11 = vsyncpa [#allocation9], 0 }
   0x3   :  { %12 = vsyncpa [#allocation4], 0  ;;  %s2776_s15 = smov [#allocation5]  }
   0x4   :  { %s28_s16 = sshll.u32 %s2776_s15, 4  ;;  %s29_s16 = int_to_ptr.vmem [resolvable:$true] %s28_s16 }
   0x5   :  { %s2676_s17 = scalar_lea.vmem %s29_s16, 32768  ;;  %p2681_p1 = scmp.lt.s32.totalorder %s29_s16, %s29_s16 }
   0x6   :  { %p2677_p0 = scmp.ne.s32.totalorder %s29_s16, %s2676_s17  ;;  %p2682_p2 = scmp.lt.s32.totalorder %s2676_s17, %s2676_s17 }
   0x8   :  { %p2683_p3 = por %p2682_p2, %p2681_p1 }
   0xa   :  { %p2684_p4 = pnand %p2683_p3, %p2677_p0 }
   0xc   :  { %2687 = shalt.err (!%p2684_p4)
}
   0xd   :  { %s2777_s18 = smov 256   ;;  %s2778_s19 = smov 16  }
   0xe   :  { %34 = dma.hbm_to_vmem [thread:$0]  %s2856_s1, 32768, %s29_s16, [#allocation6], %s2777_s18, %s2777_s18, %s2778_s19  }
   0xf   :  { %s2779_s22 = smov [#allocation2]   ;;  %s2780_s24 = smov [#allocation7]  }
  0x10   :  { %s19_s23 = sshll.u32 %s2779_s22, 4  ;;  %s41_s25 = sshll.u32 %s2780_s24, 4  ;;  %s20_s23 = int_to_ptr.vmem [resolvable:$true] %s19_s23  ;;  %s42_s25 = int_to_ptr.vmem [resolvable:$true] %s41_s25 }
  0x11   :  { %s2696_s26 = scalar_lea.vmem %s20_s23, 1024  ;;  %p2701_p6 = scmp.lt.s32.totalorder %s20_s23, %s20_s23 }
  0x12   :  { %p2697_p5 = scmp.ne.s32.totalorder %s20_s23, %s2696_s26  ;;  %p2702_p7 = scmp.lt.s32.totalorder %s2696_s26, %s2696_s26 }
  0x14   :  { %p2703_p8 = por %p2702_p7, %p2701_p6 }
  0x16   :  { %p2704_p9 = pnand %p2703_p8, %p2697_p5 }
  0x18   :  { %2707 = shalt.err (!%p2704_p9)
}
  0x19   :  { %22 = dma.hbm_to_vmem [thread:$0]  %s2855_s0, 1024, %s20_s23, [#allocation3]  }
  0x1a   :  { %s2716_s29 = scalar_lea.vmem %s42_s25, 64  ;;  %p2721_p11 = scmp.lt.s32.totalorder %s42_s25, %s42_s25 }
  0x1b   :  { %p2717_p10 = scmp.ne.s32.totalorder %s42_s25, %s2716_s29  ;;  %p2722_p12 = scmp.lt.s32.totalorder %s2716_s29, %s2716_s29 }
  0x1d   :  { %p2723_p13 = por %p2722_p12, %p2721_p11 }
  0x1f   :  { %p2724_p0 = pnand %p2723_p13, %p2717_p10 }
  0x21   :  { %2727 = shalt.err (!%p2724_p0)
}
  0x22   :  { %44 = dma.hbm_to_vmem [thread:$0]  %s2857_s2, 64, %s42_s25, [#allocation6]  }
  0x23   :  { %s2781_s5 = smov [#allocation8]  }
  0x24   :  { %s51_s6 = sshll.u32 %s2781_s5, 4  ;;  %s52_s6 = int_to_ptr.vmem [resolvable:$true] %s51_s6 }
  0x25   :  { %s2736_s7 = scalar_lea.vmem %s52_s6, 128  ;;  %p2741_p2 = scmp.lt.s32.totalorder %s52_s6, %s52_s6 }
  0x26   :  { %p2737_p1 = scmp.ne.s32.totalorder %s52_s6, %s2736_s7  ;;  %p2742_p3 = scmp.lt.s32.totalorder %s2736_s7, %s2736_s7 }
  0x28   :  { %p2743_p4 = por %p2742_p3, %p2741_p2 }
  0x2a   :  { %p2744_p5 = pnand %p2743_p4, %p2737_p1 }
  0x2c   :  { %2747 = shalt.err (!%p2744_p5)
}
  0x2d   :  { %54 = dma.hbm_to_vmem [thread:$0]  %s2858_s3, 128, %s52_s6, [#allocation9]  }
  0x2e   :  { %2768 = dma.done.wait [#allocation3], 1024  }
  0x2f   :  { %2769 = vsyncadd [#allocation3], 4294966272 }
  0x30   :  { %2770 = dma.done.wait [#allocation6], 32832  }
  0x31   :  { %2771 = vsyncadd [#allocation6], 4294934464 }
  0x32   :  { %2772 = dma.done.wait [#allocation9], 128  }
  0x33   :  { %2773 = vsyncadd [#allocation9], 4294967168  ;;  %v2274_v0 = vld [vmem:[#allocation5 + $0xe4] ss:$16 sps:$4 sm:$0xff]   ;;  %v2278_v2 = vld [vmem:[#allocation5 + $0xe0] ss:$16 sps:$4 sm:$0xff]  }
  0x34   :  { %v2276_v1 = vld [vmem:[#allocation5 + $0x2e4] ss:$16 sps:$4 sm:$0xff]   ;;  %1641 = vmatprep.subr.bf16.mxu0 %v2274_v0  ;;  %v2279_v3 = vld [vmem:[#allocation5 + $0x2e0] ss:$16 sps:$4 sm:$0xff]   ;;  %v68_v46 = vld [vmem:[#allocation2 + $0x8] sm:$0xff]  ;;  %s2782_s2 = smov [#allocation10]  }
  0x35   :  { %1682 = vmatprep.subr.bf16.mxu1 %v2276_v1  ;;  %v2280_v4 = vld [vmem:[#allocation5 + $0xc4] ss:$16 sps:$4 sm:$0xff]   ;;  %1642 = vmatpush1.bf16.msra.mxu0 %v2278_v2  ;;  %v2284_v6 = vld [vmem:[#allocation5 + $0xc0] ss:$16 sps:$4 sm:$0xff]   ;;  %v2820_v49 = vpack.c.bf16 %v68_v46, %v68_v46  ;;  %v70_v50 = vld [vmem:[#allocation2 + $0x18] sm:$0xff]  ;;  %s1998_s3 = sshll.u32 %s2782_s2, 4  ;;  %s1999_s3 = int_to_ptr.vmem [resolvable:$true] %s1998_s3 }
  0x36   :  { %1683 = vmatpush1.bf16.msra.mxu1 %v2279_v3  ;;  %v2282_v5 = vld [vmem:[#allocation5 + $0x2c4] ss:$16 sps:$4 sm:$0xff]   ;;  %1643 = vmatprep.subr.bf16.mxu0 %v2280_v4  ;;  %v2285_v7 = vld [vmem:[#allocation5 + $0x2c0] ss:$16 sps:$4 sm:$0xff]   ;;  %v2822_v52 = vpack.c.bf16 %v70_v50, %v70_v50  ;;  %s2748_s9 = scalar_lea.vmem %s1999_s3, 384  ;;  %p2753_p7 = scmp.lt.s32.totalorder %s1999_s3, %s1999_s3 }
  0x37   :  { %1684 = vmatprep.subr.bf16.mxu1 %v2282_v5  ;;  %v2286_v8 = vld [vmem:[#allocation5 + $0xa4] ss:$16 sps:$4 sm:$0xff]   ;;  %v2290_v10 = vld [vmem:[#allocation5 + $0xa0] ss:$16 sps:$4 sm:$0xff]   ;;  %1673 = vmatprep.mubr.bf16.mxu0 %v2820_v49  ;;  %p2749_p6 = scmp.ne.s32.totalorder %s1999_s3, %s2748_s9  ;;  %p2754_p8 = scmp.lt.s32.totalorder %s2748_s9, %s2748_s9 }
  0x38   :  { %v2288_v9 = vld [vmem:[#allocation5 + $0x2a4] ss:$16 sps:$4 sm:$0xff]   ;;  %v2291_v11 = vld [vmem:[#allocation5 + $0x2a0] ss:$16 sps:$4 sm:$0xff]   ;;  %1714 = vmatprep.mubr.bf16.mxu1 %v2822_v52 }
  0x39   :  { %1644 = vmatpush1.bf16.msra.mxu0 %v2284_v6  ;;  %v2292_v12 = vld [vmem:[#allocation5 + $0x84] ss:$16 sps:$4 sm:$0xff]   ;;  %v2296_v14 = vld [vmem:[#allocation5 + $0x80] ss:$16 sps:$4 sm:$0xff]   ;;  %p2755_p9 = por %p2754_p8, %p2753_p7 }
  0x3a   :  { %1685 = vmatpush1.bf16.msra.mxu1 %v2285_v7  ;;  %1645 = vmatprep.subr.bf16.mxu0 %v2286_v8  ;;  %v2294_v13 = vld [vmem:[#allocation5 + $0x284] ss:$16 sps:$4 sm:$0xff]   ;;  %v2297_v15 = vld [vmem:[#allocation5 + $0x280] ss:$16 sps:$4 sm:$0xff]  }
  0x3b   :  { %1686 = vmatprep.subr.bf16.mxu1 %v2288_v9  ;;  %v2298_v16 = vld [vmem:[#allocation5 + $0x64] ss:$16 sps:$4 sm:$0xff]   ;;  %v2302_v18 = vld [vmem:[#allocation5 + $0x60] ss:$16 sps:$4 sm:$0xff]   ;;  %p2756_p10 = pnand %p2755_p9, %p2749_p6 }
  0x3c   :  { %v2300_v17 = vld [vmem:[#allocation5 + $0x264] ss:$16 sps:$4 sm:$0xff]   ;;  %v2303_v19 = vld [vmem:[#allocation5 + $0x260] ss:$16 sps:$4 sm:$0xff]  }
  0x3d   :  { %1646 = vmatpush1.bf16.msra.mxu0 %v2290_v10  ;;  %v2304_v20 = vld [vmem:[#allocation5 + $0x44] ss:$16 sps:$4 sm:$0xff]   ;;  %v2308_v22 = vld [vmem:[#allocation5 + $0x40] ss:$16 sps:$4 sm:$0xff]  }
  0x3e   :  { %1687 = vmatpush1.bf16.msra.mxu1 %v2291_v11  ;;  %1647 = vmatprep.subr.bf16.mxu0 %v2292_v12  ;;  %v2306_v21 = vld [vmem:[#allocation5 + $0x244] ss:$16 sps:$4 sm:$0xff]   ;;  %v2309_v23 = vld [vmem:[#allocation5 + $0x240] ss:$16 sps:$4 sm:$0xff]  }
  0x3f   :  { %1688 = vmatprep.subr.bf16.mxu1 %v2294_v13  ;;  %v2310_v24 = vld [vmem:[#allocation5 + $0x24] ss:$16 sps:$4 sm:$0xff]   ;;  %v2314_v26 = vld [vmem:[#allocation5 + $0x20] ss:$16 sps:$4 sm:$0xff]  }
  0x40   :  { %v2312_v25 = vld [vmem:[#allocation5 + $0x224] ss:$16 sps:$4 sm:$0xff]   ;;  %v2315_v27 = vld [vmem:[#allocation5 + $0x220] ss:$16 sps:$4 sm:$0xff]  }
  0x41   :  { %1648 = vmatpush1.bf16.msra.mxu0 %v2296_v14  ;;  %v2316_v28 = vld [vmem:[#allocation5 + $0x4] ss:$16 sps:$4 sm:$0xff]   ;;  %v2320_v30 = vld [vmem:[#allocation5] ss:$16 sps:$4 sm:$0xff]  }
  0x42   :  { %1689 = vmatpush1.bf16.msra.mxu1 %v2297_v15  ;;  %1649 = vmatprep.subr.bf16.mxu0 %v2298_v16  ;;  %v2318_v29 = vld [vmem:[#allocation5 + $0x204] ss:$16 sps:$4 sm:$0xff]   ;;  %v2321_v31 = vld [vmem:[#allocation5 + $0x200] ss:$16 sps:$4 sm:$0xff]  }
  0x43   :  { %1690 = vmatprep.subr.bf16.mxu1 %v2300_v17  ;;  %v2322_v32 = vld [vmem:[#allocation5 + $0x1e4] ss:$16 sps:$4 sm:$0xff]   ;;  %v2326_v34 = vld [vmem:[#allocation5 + $0x1e0] ss:$16 sps:$4 sm:$0xff]  }
  0x44   :  { %v2324_v33 = vld [vmem:[#allocation5 + $0x3e4] ss:$16 sps:$4 sm:$0xff]   ;;  %v2327_v35 = vld [vmem:[#allocation5 + $0x3e0] ss:$16 sps:$4 sm:$0xff]  }
  0x45   :  { %1650 = vmatpush1.bf16.msra.mxu0 %v2302_v18  ;;  %v2328_v36 = vld [vmem:[#allocation5 + $0x1c4] ss:$16 sps:$4 sm:$0xff]   ;;  %v2332_v38 = vld [vmem:[#allocation5 + $0x1c0] ss:$16 sps:$4 sm:$0xff]  }
  0x46   :  { %1691 = vmatpush1.bf16.msra.mxu1 %v2303_v19  ;;  %1651 = vmatprep.subr.bf16.mxu0 %v2304_v20  ;;  %v2330_v37 = vld [vmem:[#allocation5 + $0x3c4] ss:$16 sps:$4 sm:$0xff]   ;;  %v2333_v39 = vld [vmem:[#allocation5 + $0x3c0] ss:$16 sps:$4 sm:$0xff]  }
  0x47   :  { %1692 = vmatprep.subr.bf16.mxu1 %v2306_v21  ;;  %v2334_v40 = vld [vmem:[#allocation5 + $0x1a4] ss:$16 sps:$4 sm:$0xff]   ;;  %v2338_v42 = vld [vmem:[#allocation5 + $0x1a0] ss:$16 sps:$4 sm:$0xff]  }
  0x48   :  { %v2336_v41 = vld [vmem:[#allocation5 + $0x3a4] ss:$16 sps:$4 sm:$0xff]   ;;  %v2339_v43 = vld [vmem:[#allocation5 + $0x3a0] ss:$16 sps:$4 sm:$0xff]  }
  0x49   :  { %1652 = vmatpush1.bf16.msra.mxu0 %v2308_v22  ;;  %v2340_v44 = vld [vmem:[#allocation5 + $0x184] ss:$16 sps:$4 sm:$0xff]   ;;  %v2344_v47 = vld [vmem:[#allocation5 + $0x180] ss:$16 sps:$4 sm:$0xff]  }
  0x4a   :  { %1693 = vmatpush1.bf16.msra.mxu1 %v2309_v23  ;;  %1653 = vmatprep.subr.bf16.mxu0 %v2310_v24  ;;  %v2342_v45 = vld [vmem:[#allocation5 + $0x384] ss:$16 sps:$4 sm:$0xff]   ;;  %v2345_v48 = vld [vmem:[#allocation5 + $0x380] ss:$16 sps:$4 sm:$0xff]  }
  0x4b   :  { %1694 = vmatprep.subr.bf16.mxu1 %v2312_v25  ;;  %v2346_v51 = vld [vmem:[#allocation5 + $0x164] ss:$16 sps:$4 sm:$0xff]   ;;  %v2350_v54 = vld [vmem:[#allocation5 + $0x160] ss:$16 sps:$4 sm:$0xff]  }
  0x4c   :  { %v2348_v53 = vld [vmem:[#allocation5 + $0x364] ss:$16 sps:$4 sm:$0xff]   ;;  %v2351_v55 = vld [vmem:[#allocation5 + $0x360] ss:$16 sps:$4 sm:$0xff]  }
  0x4d   :  { %1654 = vmatpush1.bf16.msra.mxu0 %v2314_v26  ;;  %v2352_v56 = vld [vmem:[#allocation5 + $0x144] ss:$16 sps:$4 sm:$0xff]   ;;  %v2356_v58 = vld [vmem:[#allocation5 + $0x140] ss:$16 sps:$4 sm:$0xff]  }
  0x4e   :  { %1695 = vmatpush1.bf16.msra.mxu1 %v2315_v27  ;;  %1655 = vmatprep.subr.bf16.mxu0 %v2316_v28  ;;  %v2354_v57 = vld [vmem:[#allocation5 + $0x344] ss:$16 sps:$4 sm:$0xff]   ;;  %v2357_v59 = vld [vmem:[#allocation5 + $0x340] ss:$16 sps:$4 sm:$0xff]  }
  0x4f   :  { %1696 = vmatprep.subr.bf16.mxu1 %v2318_v29  ;;  %v2358_v60 = vld [vmem:[#allocation5 + $0x124] ss:$16 sps:$4 sm:$0xff]   ;;  %v2362_v62 = vld [vmem:[#allocation5 + $0x120] ss:$16 sps:$4 sm:$0xff]  }
  0x50   :  { %v2360_v61 = vld [vmem:[#allocation5 + $0x324] ss:$16 sps:$4 sm:$0xff]   ;;  %v2363_v63 = vld [vmem:[#allocation5 + $0x320] ss:$16 sps:$4 sm:$0xff]  }
  0x51   :  { %1656 = vmatpush1.bf16.msra.mxu0 %v2320_v30  ;;  %v2364_v0 = vld [vmem:[#allocation5 + $0x104] ss:$16 sps:$4 sm:$0xff]   ;;  %v2368_v2 = vld [vmem:[#allocation5 + $0x100] ss:$16 sps:$4 sm:$0xff]  }
  0x52   :  { %1697 = vmatpush1.bf16.msra.mxu1 %v2321_v31  ;;  %1657 = vmatprep.subr.bf16.mxu0 %v2322_v32  ;;  %v2366_v1 = vld [vmem:[#allocation5 + $0x304] ss:$16 sps:$4 sm:$0xff]   ;;  %v2369_v3 = vld [vmem:[#allocation5 + $0x300] ss:$16 sps:$4 sm:$0xff]  }
  0x53   :  { %1698 = vmatprep.subr.bf16.mxu1 %v2324_v33  ;;  %v67_v4 = vld [vmem:[#allocation2] sm:$0xff]  ;;  %v69_v5 = vld [vmem:[#allocation2 + $0x10] sm:$0xff] }
  0x54   :  { %v2372_v6 = vld [vmem:[#allocation5 + $0x4e4] ss:$16 sps:$4 sm:$0xff]   ;;  %v2826_v8 = vpack.c.bf16 %v67_v4, %v67_v4  ;;  %v2828_v9 = vpack.c.bf16 %v69_v5, %v69_v5  ;;  %v2370_v10 = vld [vmem:[#allocation5 + $0x4e0] ss:$16 sps:$4 sm:$0xff]  }
  0x55   :  { %1658 = vmatpush2.bf16.msra.mxu0 %v2326_v34  ;;  %v2375_v7 = vld [vmem:[#allocation5 + $0x6e4] ss:$16 sps:$4 sm:$0xff]   ;;  %v2373_v11 = vld [vmem:[#allocation5 + $0x6e0] ss:$16 sps:$4 sm:$0xff]   ;;  %v72_v34 = vld [vmem:[#allocation2 + $0x28] sm:$0xff] }
  0x56   :  { %1699 = vmatpush2.bf16.msra.mxu1 %v2327_v35  ;;  %1659 = vmatprep.subr.bf16.mxu0 %v2328_v36  ;;  %v2378_v12 = vld [vmem:[#allocation5 + $0x4c4] ss:$16 sps:$4 sm:$0xff]   ;;  %v2376_v14 = vld [vmem:[#allocation5 + $0x4c0] ss:$16 sps:$4 sm:$0xff]  }
  0x57   :  { %1700 = vmatprep.subr.bf16.mxu1 %v2330_v37  ;;  %v2381_v13 = vld [vmem:[#allocation5 + $0x6c4] ss:$16 sps:$4 sm:$0xff]   ;;  %v2379_v15 = vld [vmem:[#allocation5 + $0x6c0] ss:$16 sps:$4 sm:$0xff]   ;;  %v2832_v37 = vpack.c.bf16 %v72_v34, %v72_v34  ;;  %v2484_v34 = vld [vmem:[#allocation5 + $0x88] ss:$16 sps:$4 sm:$0xff]  }
  0x58   :  { %v2384_v16 = vld [vmem:[#allocation5 + $0x4a4] ss:$16 sps:$4 sm:$0xff]   ;;  %v2382_v18 = vld [vmem:[#allocation5 + $0x4a0] ss:$16 sps:$4 sm:$0xff]  }
  0x59   :  { %1660 = vmatpush2.bf16.msra.mxu0 %v2332_v38  ;;  %v2387_v17 = vld [vmem:[#allocation5 + $0x6a4] ss:$16 sps:$4 sm:$0xff]   ;;  %v2385_v19 = vld [vmem:[#allocation5 + $0x6a0] ss:$16 sps:$4 sm:$0xff]   ;;  %v74_v38 = vld [vmem:[#allocation2 + $0x38] sm:$0xff] }
  0x5a   :  { %1701 = vmatpush2.bf16.msra.mxu1 %v2333_v39  ;;  %1661 = vmatprep.subr.bf16.mxu0 %v2334_v40  ;;  %v2390_v20 = vld [vmem:[#allocation5 + $0x484] ss:$16 sps:$4 sm:$0xff]   ;;  %v2388_v22 = vld [vmem:[#allocation5 + $0x480] ss:$16 sps:$4 sm:$0xff]   ;;  %v2834_v40 = vpack.c.bf16 %v74_v38, %v74_v38  ;;  %v2495_v38 = vld [vmem:[#allocation5 + $0x26c] ss:$16 sps:$4 sm:$0xff]  }
  0x5b   :  { %1702 = vmatprep.subr.bf16.mxu1 %v2336_v41  ;;  %v2393_v21 = vld [vmem:[#allocation5 + $0x684] ss:$16 sps:$4 sm:$0xff]   ;;  %v2391_v23 = vld [vmem:[#allocation5 + $0x680] ss:$16 sps:$4 sm:$0xff]  }
  0x5c   :  { %v2396_v24 = vld [vmem:[#allocation5 + $0x464] ss:$16 sps:$4 sm:$0xff]   ;;  %v2394_v26 = vld [vmem:[#allocation5 + $0x460] ss:$16 sps:$4 sm:$0xff]  }
  0x5d   :  { %1662 = vmatpush2.bf16.msra.mxu0 %v2338_v42  ;;  %v2399_v25 = vld [vmem:[#allocation5 + $0x664] ss:$16 sps:$4 sm:$0xff]   ;;  %v2397_v27 = vld [vmem:[#allocation5 + $0x660] ss:$16 sps:$4 sm:$0xff]  }
  0x5e   :  { %1703 = vmatpush2.bf16.msra.mxu1 %v2339_v43  ;;  %1663 = vmatprep.subr.bf16.mxu0 %v2340_v44  ;;  %v2402_v28 = vld [vmem:[#allocation5 + $0x444] ss:$16 sps:$4 sm:$0xff]   ;;  %v2400_v30 = vld [vmem:[#allocation5 + $0x440] ss:$16 sps:$4 sm:$0xff]  }
  0x5f   :  { %1704 = vmatprep.subr.bf16.mxu1 %v2342_v45  ;;  %v2405_v29 = vld [vmem:[#allocation5 + $0x644] ss:$16 sps:$4 sm:$0xff]   ;;  %v2403_v31 = vld [vmem:[#allocation5 + $0x640] ss:$16 sps:$4 sm:$0xff]  }
  0x60   :  { %v2408_v32 = vld [vmem:[#allocation5 + $0x424] ss:$16 sps:$4 sm:$0xff]   ;;  %v2406_v35 = vld [vmem:[#allocation5 + $0x420] ss:$16 sps:$4 sm:$0xff]  }
  0x61   :  { %1664 = vmatpush2.bf16.msra.mxu0 %v2344_v47  ;;  %v2411_v33 = vld [vmem:[#allocation5 + $0x624] ss:$16 sps:$4 sm:$0xff]   ;;  %v2409_v36 = vld [vmem:[#allocation5 + $0x620] ss:$16 sps:$4 sm:$0xff]  }
  0x62   :  { %1705 = vmatpush2.bf16.msra.mxu1 %v2345_v48  ;;  %1665 = vmatprep.subr.bf16.mxu0 %v2346_v51  ;;  %v2414_v39 = vld [vmem:[#allocation5 + $0x404] ss:$16 sps:$4 sm:$0xff]   ;;  %v2412_v42 = vld [vmem:[#allocation5 + $0x400] ss:$16 sps:$4 sm:$0xff]  }
  0x63   :  { %1706 = vmatprep.subr.bf16.mxu1 %v2348_v53  ;;  %v2417_v41 = vld [vmem:[#allocation5 + $0x604] ss:$16 sps:$4 sm:$0xff]   ;;  %v2415_v43 = vld [vmem:[#allocation5 + $0x600] ss:$16 sps:$4 sm:$0xff]  }
  0x64   :  { %v2420_v44 = vld [vmem:[#allocation5 + $0x5e4] ss:$16 sps:$4 sm:$0xff]   ;;  %v2418_v46 = vld [vmem:[#allocation5 + $0x5e0] ss:$16 sps:$4 sm:$0xff]  }
  0x65   :  { %1666 = vmatpush2.bf16.msra.mxu0 %v2350_v54  ;;  %v2423_v45 = vld [vmem:[#allocation5 + $0x7e4] ss:$16 sps:$4 sm:$0xff]   ;;  %v2421_v47 = vld [vmem:[#allocation5 + $0x7e0] ss:$16 sps:$4 sm:$0xff]  }
  0x66   :  { %1707 = vmatpush2.bf16.msra.mxu1 %v2351_v55  ;;  %1667 = vmatprep.subr.bf16.mxu0 %v2352_v56  ;;  %v2426_v48 = vld [vmem:[#allocation5 + $0x5c4] ss:$16 sps:$4 sm:$0xff]   ;;  %v2424_v51 = vld [vmem:[#allocation5 + $0x5c0] ss:$16 sps:$4 sm:$0xff]  }
  0x67   :  { %1708 = vmatprep.subr.bf16.mxu1 %v2354_v57  ;;  %v2429_v50 = vld [vmem:[#allocation5 + $0x7c4] ss:$16 sps:$4 sm:$0xff]   ;;  %v2427_v53 = vld [vmem:[#allocation5 + $0x7c0] ss:$16 sps:$4 sm:$0xff]  }
  0x68   :  { %v2432_v54 = vld [vmem:[#allocation5 + $0x5a4] ss:$16 sps:$4 sm:$0xff]   ;;  %v2430_v56 = vld [vmem:[#allocation5 + $0x5a0] ss:$16 sps:$4 sm:$0xff]  }
  0x69   :  { %1668 = vmatpush2.bf16.msra.mxu0 %v2356_v58  ;;  %v2435_v55 = vld [vmem:[#allocation5 + $0x7a4] ss:$16 sps:$4 sm:$0xff]   ;;  %v2433_v57 = vld [vmem:[#allocation5 + $0x7a0] ss:$16 sps:$4 sm:$0xff]  }
  0x6a   :  { %1709 = vmatpush2.bf16.msra.mxu1 %v2357_v59  ;;  %1669 = vmatprep.subr.bf16.mxu0 %v2358_v60  ;;  %v2438_v58 = vld [vmem:[#allocation5 + $0x584] ss:$16 sps:$4 sm:$0xff]   ;;  %v2436_v60 = vld [vmem:[#allocation5 + $0x580] ss:$16 sps:$4 sm:$0xff]  }
  0x6b   :  { %1710 = vmatprep.subr.bf16.mxu1 %v2360_v61  ;;  %v2441_v59 = vld [vmem:[#allocation5 + $0x784] ss:$16 sps:$4 sm:$0xff]   ;;  %v2439_v61 = vld [vmem:[#allocation5 + $0x780] ss:$16 sps:$4 sm:$0xff]  }
  0x6c   :  { %v2448_v4 = vld [vmem:[#allocation5 + $0x540] ss:$16 sps:$4 sm:$0xff]  }
  0x6d   :  { %1670 = vmatpush2.bf16.msra.mxu0 %v2362_v62  ;;  %v2444_v62 = vld [vmem:[#allocation5 + $0x564] ss:$16 sps:$4 sm:$0xff]   ;;  %v2451_v5 = vld [vmem:[#allocation5 + $0x740] ss:$16 sps:$4 sm:$0xff]  }
  0x6e   :  { %1711 = vmatpush2.bf16.msra.mxu1 %v2363_v63  ;;  %1671 = vmatprep.subr.bf16.mxu0 %v2364_v0  ;;  %v2447_v63 = vld [vmem:[#allocation5 + $0x764] ss:$16 sps:$4 sm:$0xff]   ;;  %v2442_v0 = vld [vmem:[#allocation5 + $0x560] ss:$16 sps:$4 sm:$0xff]  }
  0x6f   :  { %1712 = vmatprep.subr.bf16.mxu1 %v2366_v1  ;;  %v2445_v1 = vld [vmem:[#allocation5 + $0x760] ss:$16 sps:$4 sm:$0xff]  }
  0x71   :  { %1672 = vmatpush2.bf16.msra.mxu0 %v2368_v2  ;;  %v2450_v2 = vld [vmem:[#allocation5 + $0x544] ss:$16 sps:$4 sm:$0xff]  }
  0x72   :  { %1713 = vmatpush2.bf16.msra.mxu1 %v2369_v3  ;;  %1723 = vmatprep.subr.bf16.mxu0 %v2372_v6  ;;  %v2453_v3 = vld [vmem:[#allocation5 + $0x744] ss:$16 sps:$4 sm:$0xff]  }
  0x73   :  { %1764 = vmatprep.subr.bf16.mxu1 %v2375_v7  ;;  %v2456_v6 = vld [vmem:[#allocation5 + $0x524] ss:$16 sps:$4 sm:$0xff]  }
  0x74   :  { %1674 = vmatmul.mubr.bf16.vlgmr.msra.gmra.mxu0 %v2826_v8  ;;  %v2459_v7 = vld [vmem:[#allocation5 + $0x724] ss:$16 sps:$4 sm:$0xff]  }
  0x75   :  { %1715 = vmatmul.mubr.bf16.vlgmr.msra.gmra.mxu1 %v2828_v9  ;;  %1724 = vmatpush1.bf16.msra.mxu0 %v2370_v10  ;;  %v2454_v10 = vld [vmem:[#allocation5 + $0x520] ss:$16 sps:$4 sm:$0xff]  }
  0x76   :  { %1765 = vmatpush1.bf16.msra.mxu1 %v2373_v11  ;;  %1725 = vmatprep.subr.bf16.mxu0 %v2378_v12  ;;  %v2457_v11 = vld [vmem:[#allocation5 + $0x720] ss:$16 sps:$4 sm:$0xff]   ;;  %v2462_v12 = vld [vmem:[#allocation5 + $0x504] ss:$16 sps:$4 sm:$0xff]  }
  0x77   :  { %1766 = vmatprep.subr.bf16.mxu1 %v2381_v13  ;;  %1755 = vmatprep.mubr.bf16.mxu0 %v2832_v37  ;;  %v2465_v13 = vld [vmem:[#allocation5 + $0x704] ss:$16 sps:$4 sm:$0xff]  }
  0x78   :  { %1796 = vmatprep.mubr.bf16.mxu1 %v2834_v40 }
  0x79   :  { %1726 = vmatpush1.bf16.msra.mxu0 %v2376_v14  ;;  %v2460_v14 = vld [vmem:[#allocation5 + $0x500] ss:$16 sps:$4 sm:$0xff]  }
  0x7a   :  { %1767 = vmatpush1.bf16.msra.mxu1 %v2379_v15  ;;  %1727 = vmatprep.subr.bf16.mxu0 %v2384_v16  ;;  %v2463_v15 = vld [vmem:[#allocation5 + $0x700] ss:$16 sps:$4 sm:$0xff]  }
  0x7b   :  { %1768 = vmatprep.subr.bf16.mxu1 %v2387_v17  ;;  %v71_v16 = vld [vmem:[#allocation2 + $0x20] sm:$0xff]  ;;  %v73_v17 = vld [vmem:[#allocation2 + $0x30] sm:$0xff] }
  0x7d   :  { %1728 = vmatpush1.bf16.msra.mxu0 %v2382_v18  ;;  %v2468_v18 = vld [vmem:[#allocation5 + $0xec] ss:$16 sps:$4 sm:$0xff]  }
  0x7e   :  { %1769 = vmatpush1.bf16.msra.mxu1 %v2385_v19  ;;  %1729 = vmatprep.subr.bf16.mxu0 %v2390_v20  ;;  %v2471_v19 = vld [vmem:[#allocation5 + $0x2ec] ss:$16 sps:$4 sm:$0xff]   ;;  %v2838_v20 = vpack.c.bf16 %v71_v16, %v71_v16 }
  0x7f   :  { %1770 = vmatprep.subr.bf16.mxu1 %v2393_v21  ;;  %v2840_v21 = vpack.c.bf16 %v73_v17, %v73_v17  ;;  %v2552_v16 = vld [vmem:[#allocation5 + $0x12c] ss:$16 sps:$4 sm:$0xff]  }
  0x80   :  { %v2555_v17 = vld [vmem:[#allocation5 + $0x32c] ss:$16 sps:$4 sm:$0xff]  }
  0x81   :  { %1730 = vmatpush1.bf16.msra.mxu0 %v2388_v22  ;;  %v2466_v22 = vld [vmem:[#allocation5 + $0xe8] ss:$16 sps:$4 sm:$0xff]  }
  0x82   :  { %1771 = vmatpush1.bf16.msra.mxu1 %v2391_v23  ;;  %1731 = vmatprep.subr.bf16.mxu0 %v2396_v24  ;;  %v2469_v23 = vld [vmem:[#allocation5 + $0x2e8] ss:$16 sps:$4 sm:$0xff]   ;;  %v2474_v24 = vld [vmem:[#allocation5 + $0xcc] ss:$16 sps:$4 sm:$0xff]  }
  0x83   :  { %1772 = vmatprep.subr.bf16.mxu1 %v2399_v25  ;;  %v2477_v25 = vld [vmem:[#allocation5 + $0x2cc] ss:$16 sps:$4 sm:$0xff]  }
  0x85   :  { %1732 = vmatpush1.bf16.msra.mxu0 %v2394_v26  ;;  %v2472_v26 = vld [vmem:[#allocation5 + $0xc8] ss:$16 sps:$4 sm:$0xff]  }
  0x86   :  { %1773 = vmatpush1.bf16.msra.mxu1 %v2397_v27  ;;  %1733 = vmatprep.subr.bf16.mxu0 %v2402_v28  ;;  %v2475_v27 = vld [vmem:[#allocation5 + $0x2c8] ss:$16 sps:$4 sm:$0xff]   ;;  %v2480_v28 = vld [vmem:[#allocation5 + $0xac] ss:$16 sps:$4 sm:$0xff]  }
  0x87   :  { %1774 = vmatprep.subr.bf16.mxu1 %v2405_v29  ;;  %v2483_v29 = vld [vmem:[#allocation5 + $0x2ac] ss:$16 sps:$4 sm:$0xff]  }
  0x89   :  { %1734 = vmatpush1.bf16.msra.mxu0 %v2400_v30  ;;  %v2478_v30 = vld [vmem:[#allocation5 + $0xa8] ss:$16 sps:$4 sm:$0xff]  }
  0x8a   :  { %1775 = vmatpush1.bf16.msra.mxu1 %v2403_v31  ;;  %1735 = vmatprep.subr.bf16.mxu0 %v2408_v32  ;;  %v2481_v31 = vld [vmem:[#allocation5 + $0x2a8] ss:$16 sps:$4 sm:$0xff]   ;;  %v2486_v32 = vld [vmem:[#allocation5 + $0x8c] ss:$16 sps:$4 sm:$0xff]  }
  0x8b   :  { %1776 = vmatprep.subr.bf16.mxu1 %v2411_v33  ;;  %v2489_v33 = vld [vmem:[#allocation5 + $0x28c] ss:$16 sps:$4 sm:$0xff]  }
  0x8d   :  { %1736 = vmatpush1.bf16.msra.mxu0 %v2406_v35  ;;  %v2487_v35 = vld [vmem:[#allocation5 + $0x288] ss:$16 sps:$4 sm:$0xff]  }
  0x8e   :  { %1777 = vmatpush1.bf16.msra.mxu1 %v2409_v36  ;;  %1737 = vmatprep.subr.bf16.mxu0 %v2414_v39  ;;  %v2492_v36 = vld [vmem:[#allocation5 + $0x6c] ss:$16 sps:$4 sm:$0xff]   ;;  %v2490_v39 = vld [vmem:[#allocation5 + $0x68] ss:$16 sps:$4 sm:$0xff]  }
  0x8f   :  { %1778 = vmatprep.subr.bf16.mxu1 %v2417_v41  ;;  %v2501_v41 = vld [vmem:[#allocation5 + $0x24c] ss:$16 sps:$4 sm:$0xff]  }
  0x91   :  { %1738 = vmatpush1.bf16.msra.mxu0 %v2412_v42  ;;  %v2496_v42 = vld [vmem:[#allocation5 + $0x48] ss:$16 sps:$4 sm:$0xff]  }
  0x92   :  { %1779 = vmatpush1.bf16.msra.mxu1 %v2415_v43  ;;  %1739 = vmatprep.subr.bf16.mxu0 %v2420_v44  ;;  %v2499_v43 = vld [vmem:[#allocation5 + $0x248] ss:$16 sps:$4 sm:$0xff]   ;;  %v2504_v44 = vld [vmem:[#allocation5 + $0x2c] ss:$16 sps:$4 sm:$0xff]  }
  0x93   :  { %1780 = vmatprep.subr.bf16.mxu1 %v2423_v45  ;;  %v2507_v45 = vld [vmem:[#allocation5 + $0x22c] ss:$16 sps:$4 sm:$0xff]  }
  0x95   :  { %1740 = vmatpush2.bf16.msra.mxu0 %v2418_v46  ;;  %v2502_v46 = vld [vmem:[#allocation5 + $0x28] ss:$16 sps:$4 sm:$0xff]  }
  0x96   :  { %1781 = vmatpush2.bf16.msra.mxu1 %v2421_v47  ;;  %1741 = vmatprep.subr.bf16.mxu0 %v2426_v48  ;;  %v2505_v47 = vld [vmem:[#allocation5 + $0x228] ss:$16 sps:$4 sm:$0xff]   ;;  %v2510_v48 = vld [vmem:[#allocation5 + $0xc] ss:$16 sps:$4 sm:$0xff]  }
  0x97   :  { %1782 = vmatprep.subr.bf16.mxu1 %v2429_v50  ;;  %v2513_v50 = vld [vmem:[#allocation5 + $0x20c] ss:$16 sps:$4 sm:$0xff]  }
  0x99   :  { %1742 = vmatpush2.bf16.msra.mxu0 %v2424_v51  ;;  %v2508_v51 = vld [vmem:[#allocation5 + $0x8] ss:$16 sps:$4 sm:$0xff]  }
  0x9a   :  { %1783 = vmatpush2.bf16.msra.mxu1 %v2427_v53  ;;  %1743 = vmatprep.subr.bf16.mxu0 %v2432_v54  ;;  %v2511_v53 = vld [vmem:[#allocation5 + $0x208] ss:$16 sps:$4 sm:$0xff]   ;;  %v2516_v54 = vld [vmem:[#allocation5 + $0x1ec] ss:$16 sps:$4 sm:$0xff]  }
  0x9b   :  { %1784 = vmatprep.subr.bf16.mxu1 %v2435_v55  ;;  %v2519_v55 = vld [vmem:[#allocation5 + $0x3ec] ss:$16 sps:$4 sm:$0xff]  }
  0x9d   :  { %1744 = vmatpush2.bf16.msra.mxu0 %v2430_v56  ;;  %v2514_v56 = vld [vmem:[#allocation5 + $0x1e8] ss:$16 sps:$4 sm:$0xff]  }
  0x9e   :  { %1785 = vmatpush2.bf16.msra.mxu1 %v2433_v57  ;;  %1745 = vmatprep.subr.bf16.mxu0 %v2438_v58  ;;  %v2517_v57 = vld [vmem:[#allocation5 + $0x3e8] ss:$16 sps:$4 sm:$0xff]   ;;  %v2522_v58 = vld [vmem:[#allocation5 + $0x1cc] ss:$16 sps:$4 sm:$0xff]  }
  0x9f   :  { %1786 = vmatprep.subr.bf16.mxu1 %v2441_v59  ;;  %v2525_v59 = vld [vmem:[#allocation5 + $0x3cc] ss:$16 sps:$4 sm:$0xff]  }
  0xa1   :  { %1746 = vmatpush2.bf16.msra.mxu0 %v2436_v60  ;;  %v2520_v60 = vld [vmem:[#allocation5 + $0x1c8] ss:$16 sps:$4 sm:$0xff]  }
  0xa2   :  { %1787 = vmatpush2.bf16.msra.mxu1 %v2439_v61  ;;  %1747 = vmatprep.subr.bf16.mxu0 %v2444_v62  ;;  %v2523_v61 = vld [vmem:[#allocation5 + $0x3c8] ss:$16 sps:$4 sm:$0xff]   ;;  %v2528_v62 = vld [vmem:[#allocation5 + $0x1ac] ss:$16 sps:$4 sm:$0xff]  }
  0xa3   :  { %1788 = vmatprep.subr.bf16.mxu1 %v2447_v63  ;;  %v2531_v63 = vld [vmem:[#allocation5 + $0x3ac] ss:$16 sps:$4 sm:$0xff]  }
  0xa5   :  { %1748 = vmatpush2.bf16.msra.mxu0 %v2442_v0  ;;  %v2526_v0 = vld [vmem:[#allocation5 + $0x1a8] ss:$16 sps:$4 sm:$0xff]  }
  0xa6   :  { %1789 = vmatpush2.bf16.msra.mxu1 %v2445_v1  ;;  %1749 = vmatprep.subr.bf16.mxu0 %v2450_v2  ;;  %v2529_v1 = vld [vmem:[#allocation5 + $0x3a8] ss:$16 sps:$4 sm:$0xff]   ;;  %v2534_v2 = vld [vmem:[#allocation5 + $0x18c] ss:$16 sps:$4 sm:$0xff]  }
  0xa7   :  { %1790 = vmatprep.subr.bf16.mxu1 %v2453_v3  ;;  %v2537_v3 = vld [vmem:[#allocation5 + $0x38c] ss:$16 sps:$4 sm:$0xff]  }
  0xa9   :  { %1750 = vmatpush2.bf16.msra.mxu0 %v2448_v4  ;;  %v2532_v4 = vld [vmem:[#allocation5 + $0x188] ss:$16 sps:$4 sm:$0xff]  }
  0xaa   :  { %1791 = vmatpush2.bf16.msra.mxu1 %v2451_v5  ;;  %1751 = vmatprep.subr.bf16.mxu0 %v2456_v6  ;;  %v2535_v5 = vld [vmem:[#allocation5 + $0x388] ss:$16 sps:$4 sm:$0xff]   ;;  %v2540_v6 = vld [vmem:[#allocation5 + $0x16c] ss:$16 sps:$4 sm:$0xff]  }
  0xab   :  { %1792 = vmatprep.subr.bf16.mxu1 %v2459_v7  ;;  %v2543_v7 = vld [vmem:[#allocation5 + $0x36c] ss:$16 sps:$4 sm:$0xff]  }
  0xad   :  { %1752 = vmatpush2.bf16.msra.mxu0 %v2454_v10  ;;  %v2538_v10 = vld [vmem:[#allocation5 + $0x168] ss:$16 sps:$4 sm:$0xff]  }
  0xae   :  { %1793 = vmatpush2.bf16.msra.mxu1 %v2457_v11  ;;  %1753 = vmatprep.subr.bf16.mxu0 %v2462_v12  ;;  %v2541_v11 = vld [vmem:[#allocation5 + $0x368] ss:$16 sps:$4 sm:$0xff]   ;;  %v2546_v12 = vld [vmem:[#allocation5 + $0x14c] ss:$16 sps:$4 sm:$0xff]  }
  0xaf   :  { %1794 = vmatprep.subr.bf16.mxu1 %v2465_v13  ;;  %v2549_v13 = vld [vmem:[#allocation5 + $0x34c] ss:$16 sps:$4 sm:$0xff]  }
  0xb1   :  { %1754 = vmatpush2.bf16.msra.mxu0 %v2460_v14  ;;  %v2544_v14 = vld [vmem:[#allocation5 + $0x148] ss:$16 sps:$4 sm:$0xff]  }
  0xb2   :  { %1795 = vmatpush2.bf16.msra.mxu1 %v2463_v15  ;;  %1805 = vmatprep.subr.bf16.mxu0 %v2468_v18  ;;  %v2547_v15 = vld [vmem:[#allocation5 + $0x348] ss:$16 sps:$4 sm:$0xff]  }
  0xb3   :  { %1846 = vmatprep.subr.bf16.mxu1 %v2471_v19  ;;  %v2550_v18 = vld [vmem:[#allocation5 + $0x128] ss:$16 sps:$4 sm:$0xff]  }
  0xb4   :  { %1756 = vmatmul.mubr.bf16.vlgmr.msra.gmra.mxu0 %v2838_v20  ;;  %v2553_v19 = vld [vmem:[#allocation5 + $0x328] ss:$16 sps:$4 sm:$0xff]  }
  0xb5   :  { %1797 = vmatmul.mubr.bf16.vlgmr.msra.gmra.mxu1 %v2840_v21  ;;  %1806 = vmatpush1.bf16.msra.mxu0 %v2466_v22  ;;  %v2558_v22 = vld [vmem:[#allocation5 + $0x10c] ss:$16 sps:$4 sm:$0xff]  }
  0xb6   :  { %1847 = vmatpush1.bf16.msra.mxu1 %v2469_v23  ;;  %1807 = vmatprep.subr.bf16.mxu0 %v2474_v24  ;;  %v2561_v23 = vld [vmem:[#allocation5 + $0x30c] ss:$16 sps:$4 sm:$0xff]   ;;  %v2556_v24 = vld [vmem:[#allocation5 + $0x108] ss:$16 sps:$4 sm:$0xff]  }
  0xb7   :  { %1848 = vmatprep.subr.bf16.mxu1 %v2477_v25  ;;  %1837 = vmatprep.mubr.bf16.mxu0 %v2820_v49  ;;  %v2493_v49 = vld [vmem:[#allocation5 + $0x268] ss:$16 sps:$4 sm:$0xff]  }
  0xb8   :  { %1878 = vmatprep.mubr.bf16.mxu1 %v2822_v52  ;;  %v2498_v52 = vld [vmem:[#allocation5 + $0x4c] ss:$16 sps:$4 sm:$0xff]   ;;  %v2559_v25 = vld [vmem:[#allocation5 + $0x308] ss:$16 sps:$4 sm:$0xff]  }
  0xb9   :  { %1808 = vmatpush1.bf16.msra.mxu0 %v2472_v26  ;;  %v2564_v26 = vld [vmem:[#allocation5 + $0x4ec] ss:$16 sps:$4 sm:$0xff]  }
  0xba   :  { %1849 = vmatpush1.bf16.msra.mxu1 %v2475_v27  ;;  %1809 = vmatprep.subr.bf16.mxu0 %v2480_v28  ;;  %v2567_v27 = vld [vmem:[#allocation5 + $0x6ec] ss:$16 sps:$4 sm:$0xff]   ;;  %v2562_v28 = vld [vmem:[#allocation5 + $0x4e8] ss:$16 sps:$4 sm:$0xff]  }
  0xbb   :  { %1850 = vmatprep.subr.bf16.mxu1 %v2483_v29  ;;  %v2565_v29 = vld [vmem:[#allocation5 + $0x6e8] ss:$16 sps:$4 sm:$0xff]  }
  0xbd   :  { %1810 = vmatpush1.bf16.msra.mxu0 %v2478_v30  ;;  %v2570_v30 = vld [vmem:[#allocation5 + $0x4cc] ss:$16 sps:$4 sm:$0xff]  }
  0xbe   :  { %1851 = vmatpush1.bf16.msra.mxu1 %v2481_v31  ;;  %1811 = vmatprep.subr.bf16.mxu0 %v2486_v32  ;;  %v2573_v31 = vld [vmem:[#allocation5 + $0x6cc] ss:$16 sps:$4 sm:$0xff]   ;;  %v2568_v32 = vld [vmem:[#allocation5 + $0x4c8] ss:$16 sps:$4 sm:$0xff]  }
  0xbf   :  { %1852 = vmatprep.subr.bf16.mxu1 %v2489_v33  ;;  %v2571_v33 = vld [vmem:[#allocation5 + $0x6c8] ss:$16 sps:$4 sm:$0xff]  }
  0xc1   :  { %1812 = vmatpush1.bf16.msra.mxu0 %v2484_v34  ;;  %v2576_v34 = vld [vmem:[#allocation5 + $0x4ac] ss:$16 sps:$4 sm:$0xff]  }
  0xc2   :  { %1853 = vmatpush1.bf16.msra.mxu1 %v2487_v35  ;;  %1813 = vmatprep.subr.bf16.mxu0 %v2492_v36  ;;  %v2579_v35 = vld [vmem:[#allocation5 + $0x6ac] ss:$16 sps:$4 sm:$0xff]   ;;  %v2574_v36 = vld [vmem:[#allocation5 + $0x4a8] ss:$16 sps:$4 sm:$0xff]  }
  0xc3   :  { %1854 = vmatprep.subr.bf16.mxu1 %v2495_v38  ;;  %v2577_v38 = vld [vmem:[#allocation5 + $0x6a8] ss:$16 sps:$4 sm:$0xff]  }
  0xc5   :  { %1814 = vmatpush1.bf16.msra.mxu0 %v2490_v39  ;;  %v2580_v39 = vld [vmem:[#allocation5 + $0x488] ss:$16 sps:$4 sm:$0xff]  }
  0xc6   :  { %1855 = vmatpush1.bf16.msra.mxu1 %v2493_v49  ;;  %1815 = vmatprep.subr.bf16.mxu0 %v2498_v52  ;;  %v2583_v49 = vld [vmem:[#allocation5 + $0x688] ss:$16 sps:$4 sm:$0xff]   ;;  %v2588_v52 = vld [vmem:[#allocation5 + $0x46c] ss:$16 sps:$4 sm:$0xff]  }
  0xc7   :  { %1856 = vmatprep.subr.bf16.mxu1 %v2501_v41  ;;  %v2591_v41 = vld [vmem:[#allocation5 + $0x66c] ss:$16 sps:$4 sm:$0xff]  }
  0xc9   :  { %1816 = vmatpush1.bf16.msra.mxu0 %v2496_v42  ;;  %v2594_v42 = vld [vmem:[#allocation5 + $0x44c] ss:$16 sps:$4 sm:$0xff]  }
  0xca   :  { %1857 = vmatpush1.bf16.msra.mxu1 %v2499_v43  ;;  %1817 = vmatprep.subr.bf16.mxu0 %v2504_v44  ;;  %v2597_v43 = vld [vmem:[#allocation5 + $0x64c] ss:$16 sps:$4 sm:$0xff]   ;;  %v2592_v44 = vld [vmem:[#allocation5 + $0x448] ss:$16 sps:$4 sm:$0xff]  }
  0xcb   :  { %1858 = vmatprep.subr.bf16.mxu1 %v2507_v45  ;;  %v2595_v45 = vld [vmem:[#allocation5 + $0x648] ss:$16 sps:$4 sm:$0xff]  }
  0xcd   :  { %1818 = vmatpush1.bf16.msra.mxu0 %v2502_v46  ;;  %v2600_v46 = vld [vmem:[#allocation5 + $0x42c] ss:$16 sps:$4 sm:$0xff]  }
  0xce   :  { %1859 = vmatpush1.bf16.msra.mxu1 %v2505_v47  ;;  %1819 = vmatprep.subr.bf16.mxu0 %v2510_v48  ;;  %v2603_v47 = vld [vmem:[#allocation5 + $0x62c] ss:$16 sps:$4 sm:$0xff]   ;;  %v2598_v48 = vld [vmem:[#allocation5 + $0x428] ss:$16 sps:$4 sm:$0xff]  }
  0xcf   :  { %1860 = vmatprep.subr.bf16.mxu1 %v2513_v50  ;;  %v2601_v50 = vld [vmem:[#allocation5 + $0x628] ss:$16 sps:$4 sm:$0xff]  }
  0xd1   :  { %1820 = vmatpush1.bf16.msra.mxu0 %v2508_v51  ;;  %v2606_v51 = vld [vmem:[#allocation5 + $0x40c] ss:$16 sps:$4 sm:$0xff]  }
  0xd2   :  { %1861 = vmatpush1.bf16.msra.mxu1 %v2511_v53  ;;  %1821 = vmatprep.subr.bf16.mxu0 %v2516_v54  ;;  %v2609_v53 = vld [vmem:[#allocation5 + $0x60c] ss:$16 sps:$4 sm:$0xff]   ;;  %v2604_v54 = vld [vmem:[#allocation5 + $0x408] ss:$16 sps:$4 sm:$0xff]  }
  0xd3   :  { %1862 = vmatprep.subr.bf16.mxu1 %v2519_v55  ;;  %v2607_v55 = vld [vmem:[#allocation5 + $0x608] ss:$16 sps:$4 sm:$0xff]  }
  0xd5   :  { %1822 = vmatpush2.bf16.msra.mxu0 %v2514_v56  ;;  %v2612_v56 = vld [vmem:[#allocation5 + $0x5ec] ss:$16 sps:$4 sm:$0xff]  }
  0xd6   :  { %1863 = vmatpush2.bf16.msra.mxu1 %v2517_v57  ;;  %1823 = vmatprep.subr.bf16.mxu0 %v2522_v58  ;;  %v2615_v57 = vld [vmem:[#allocation5 + $0x7ec] ss:$16 sps:$4 sm:$0xff]   ;;  %v2610_v58 = vld [vmem:[#allocation5 + $0x5e8] ss:$16 sps:$4 sm:$0xff]  }
  0xd7   :  { %1864 = vmatprep.subr.bf16.mxu1 %v2525_v59  ;;  %v2613_v59 = vld [vmem:[#allocation5 + $0x7e8] ss:$16 sps:$4 sm:$0xff]  }
  0xd9   :  { %1824 = vmatpush2.bf16.msra.mxu0 %v2520_v60  ;;  %v2618_v60 = vld [vmem:[#allocation5 + $0x5cc] ss:$16 sps:$4 sm:$0xff]  }
  0xda   :  { %1865 = vmatpush2.bf16.msra.mxu1 %v2523_v61  ;;  %1825 = vmatprep.subr.bf16.mxu0 %v2528_v62  ;;  %v2621_v61 = vld [vmem:[#allocation5 + $0x7cc] ss:$16 sps:$4 sm:$0xff]   ;;  %v2616_v62 = vld [vmem:[#allocation5 + $0x5c8] ss:$16 sps:$4 sm:$0xff]  }
  0xdb   :  { %1866 = vmatprep.subr.bf16.mxu1 %v2531_v63  ;;  %v2619_v63 = vld [vmem:[#allocation5 + $0x7c8] ss:$16 sps:$4 sm:$0xff]  }
  0xdd   :  { %1826 = vmatpush2.bf16.msra.mxu0 %v2526_v0  ;;  %v2624_v0 = vld [vmem:[#allocation5 + $0x5ac] ss:$16 sps:$4 sm:$0xff]  }
  0xde   :  { %1867 = vmatpush2.bf16.msra.mxu1 %v2529_v1  ;;  %1827 = vmatprep.subr.bf16.mxu0 %v2534_v2  ;;  %v2627_v1 = vld [vmem:[#allocation5 + $0x7ac] ss:$16 sps:$4 sm:$0xff]   ;;  %v2622_v2 = vld [vmem:[#allocation5 + $0x5a8] ss:$16 sps:$4 sm:$0xff]  }
  0xdf   :  { %1868 = vmatprep.subr.bf16.mxu1 %v2537_v3  ;;  %v2625_v3 = vld [vmem:[#allocation5 + $0x7a8] ss:$16 sps:$4 sm:$0xff]  }
  0xe1   :  { %1828 = vmatpush2.bf16.msra.mxu0 %v2532_v4  ;;  %v2630_v4 = vld [vmem:[#allocation5 + $0x58c] ss:$16 sps:$4 sm:$0xff]  }
  0xe2   :  { %1869 = vmatpush2.bf16.msra.mxu1 %v2535_v5  ;;  %1829 = vmatprep.subr.bf16.mxu0 %v2540_v6  ;;  %v2633_v5 = vld [vmem:[#allocation5 + $0x78c] ss:$16 sps:$4 sm:$0xff]   ;;  %v2628_v6 = vld [vmem:[#allocation5 + $0x588] ss:$16 sps:$4 sm:$0xff]  }
  0xe3   :  { %1870 = vmatprep.subr.bf16.mxu1 %v2543_v7  ;;  %v2631_v7 = vld [vmem:[#allocation5 + $0x788] ss:$16 sps:$4 sm:$0xff]  }
  0xe5   :  { %1830 = vmatpush2.bf16.msra.mxu0 %v2538_v10  ;;  %v2636_v10 = vld [vmem:[#allocation5 + $0x56c] ss:$16 sps:$4 sm:$0xff]  }
  0xe6   :  { %1871 = vmatpush2.bf16.msra.mxu1 %v2541_v11  ;;  %1831 = vmatprep.subr.bf16.mxu0 %v2546_v12  ;;  %v2639_v11 = vld [vmem:[#allocation5 + $0x76c] ss:$16 sps:$4 sm:$0xff]   ;;  %v2634_v12 = vld [vmem:[#allocation5 + $0x568] ss:$16 sps:$4 sm:$0xff]  }
  0xe7   :  { %1872 = vmatprep.subr.bf16.mxu1 %v2549_v13  ;;  %v2637_v13 = vld [vmem:[#allocation5 + $0x768] ss:$16 sps:$4 sm:$0xff]  }
  0xe9   :  { %1832 = vmatpush2.bf16.msra.mxu0 %v2544_v14  ;;  %v2642_v14 = vld [vmem:[#allocation5 + $0x54c] ss:$16 sps:$4 sm:$0xff]  }
  0xea   :  { %1873 = vmatpush2.bf16.msra.mxu1 %v2547_v15  ;;  %1833 = vmatprep.subr.bf16.mxu0 %v2552_v16  ;;  %v2645_v15 = vld [vmem:[#allocation5 + $0x74c] ss:$16 sps:$4 sm:$0xff]   ;;  %v2640_v16 = vld [vmem:[#allocation5 + $0x548] ss:$16 sps:$4 sm:$0xff]  }
  0xeb   :  { %1874 = vmatprep.subr.bf16.mxu1 %v2555_v17  ;;  %v2643_v17 = vld [vmem:[#allocation5 + $0x748] ss:$16 sps:$4 sm:$0xff]  }
  0xed   :  { %1834 = vmatpush2.bf16.msra.mxu0 %v2550_v18  ;;  %v341_v18 = vlaneseq }
  0xee   :  { %1875 = vmatpush2.bf16.msra.mxu1 %v2553_v19  ;;  %1835 = vmatprep.subr.bf16.mxu0 %v2558_v22  ;;  %v2648_v19 = vld [vmem:[#allocation5 + $0x52c] ss:$16 sps:$4 sm:$0xff]  }
  0xef   :  { %1876 = vmatprep.subr.bf16.mxu1 %v2561_v23  ;;  %v2651_v22 = vld [vmem:[#allocation5 + $0x72c] ss:$16 sps:$4 sm:$0xff]   ;;  %v2646_v23 = vld [vmem:[#allocation5 + $0x528] ss:$16 sps:$4 sm:$0xff]  }
  0xf1   :  { %1836 = vmatpush2.bf16.msra.mxu0 %v2556_v24  ;;  %v2649_v24 = vld [vmem:[#allocation5 + $0x728] ss:$16 sps:$4 sm:$0xff]  }
  0xf2   :  { %1877 = vmatpush2.bf16.msra.mxu1 %v2559_v25  ;;  %1887 = vmatprep.subr.bf16.mxu0 %v2564_v26  ;;  %v342_v25 = vshrl.u32 %v341_v18, 7  ;;  %v2654_v26 = vld [vmem:[#allocation5 + $0x50c] ss:$16 sps:$4 sm:$0xff]  }
  0xf3   :  { %1928 = vmatprep.subr.bf16.mxu1 %v2567_v27  ;;  %v2657_v27 = vld [vmem:[#allocation5 + $0x70c] ss:$16 sps:$4 sm:$0xff]  }
  0xf4   :  { %1838 = vmatmul.mubr.bf16.vlgmr.msra.gmra.mxu0 %v2826_v8  ;;  %v2582_v8 = vld [vmem:[#allocation5 + $0x48c] ss:$16 sps:$4 sm:$0xff]  }
  0xf5   :  { %1879 = vmatmul.mubr.bf16.vlgmr.msra.gmra.mxu1 %v2828_v9  ;;  %1888 = vmatpush1.bf16.msra.mxu0 %v2562_v28  ;;  %v2585_v9 = vld [vmem:[#allocation5 + $0x68c] ss:$16 sps:$4 sm:$0xff]   ;;  %v2652_v28 = vld [vmem:[#allocation5 + $0x508] ss:$16 sps:$4 sm:$0xff]  }
  0xf6   :  { %1929 = vmatpush1.bf16.msra.mxu1 %v2565_v29  ;;  %1889 = vmatprep.subr.bf16.mxu0 %v2570_v30  ;;  %v2655_v29 = vld [vmem:[#allocation5 + $0x708] ss:$16 sps:$4 sm:$0xff]   ;;  %v343_v30 = vsub.s32 0, %v342_v25 }
  0xf7   :  { %1930 = vmatprep.subr.bf16.mxu1 %v2573_v31  ;;  %1919 = vmatprep.mubr.bf16.mxu0 %v2832_v37  ;;  %v2586_v37 = vld [vmem:[#allocation5 + $0x468] ss:$16 sps:$4 sm:$0xff]   ;;  %v339_v31 = vld [vmem:[#allocation7] sm:$0xf] }
  0xf8   :  { %1960 = vmatprep.mubr.bf16.mxu1 %v2834_v40  ;;  %v2589_v40 = vld [vmem:[#allocation5 + $0x668] ss:$16 sps:$4 sm:$0xff]  }
  0xf9   :  { %1890 = vmatpush1.bf16.msra.mxu0 %v2568_v32  ;;  %v347_v32 = vsub.s32 1, %v342_v25 }
  0xfa   :  { %1931 = vmatpush1.bf16.msra.mxu1 %v2571_v33  ;;  %1891 = vmatprep.subr.bf16.mxu0 %v2576_v34  ;;  %v344_v33 = vrot.slane %v339_v31, %v343_v30 }
  0xfb   :  { %1932 = vmatprep.subr.bf16.mxu1 %v2579_v35  ;;  %v348_v34 = vrot.slane %v339_v31, %v347_v32 }
  0xfd   :  { %1892 = vmatpush1.bf16.msra.mxu0 %v2574_v36 }
  0xfe   :  { %1933 = vmatpush1.bf16.msra.mxu1 %v2577_v38  ;;  %1893 = vmatprep.subr.bf16.mxu0 %v2582_v8 }
  0xff   :  { %1934 = vmatprep.subr.bf16.mxu1 %v2585_v9 }
 0x101   :  { %1894 = vmatpush1.bf16.msra.mxu0 %v2580_v39 }
 0x102   :  { %1935 = vmatpush1.bf16.msra.mxu1 %v2583_v49  ;;  %1895 = vmatprep.subr.bf16.mxu0 %v2588_v52 }
 0x103   :  { %1936 = vmatprep.subr.bf16.mxu1 %v2591_v41 }
 0x105   :  { %1896 = vmatpush1.bf16.msra.mxu0 %v2586_v37 }
 0x106   :  { %1937 = vmatpush1.bf16.msra.mxu1 %v2589_v40  ;;  %1897 = vmatprep.subr.bf16.mxu0 %v2594_v42 }
 0x107   :  { %1938 = vmatprep.subr.bf16.mxu1 %v2597_v43 }
 0x109   :  { %1898 = vmatpush1.bf16.msra.mxu0 %v2592_v44 }
 0x10a   :  { %1939 = vmatpush1.bf16.msra.mxu1 %v2595_v45  ;;  %1899 = vmatprep.subr.bf16.mxu0 %v2600_v46 }
 0x10b   :  { %1940 = vmatprep.subr.bf16.mxu1 %v2603_v47 }
 0x10d   :  { %1900 = vmatpush1.bf16.msra.mxu0 %v2598_v48 }
 0x10e   :  { %1941 = vmatpush1.bf16.msra.mxu1 %v2601_v50  ;;  %1901 = vmatprep.subr.bf16.mxu0 %v2606_v51 }
 0x10f   :  { %1942 = vmatprep.subr.bf16.mxu1 %v2609_v53 }
 0x111   :  { %1902 = vmatpush1.bf16.msra.mxu0 %v2604_v54 }
 0x112   :  { %1943 = vmatpush1.bf16.msra.mxu1 %v2607_v55  ;;  %1903 = vmatprep.subr.bf16.mxu0 %v2612_v56 }
 0x113   :  { %1944 = vmatprep.subr.bf16.mxu1 %v2615_v57 }
 0x115   :  { %1904 = vmatpush2.bf16.msra.mxu0 %v2610_v58 }
 0x116   :  { %1945 = vmatpush2.bf16.msra.mxu1 %v2613_v59  ;;  %1905 = vmatprep.subr.bf16.mxu0 %v2618_v60 }
 0x117   :  { %1946 = vmatprep.subr.bf16.mxu1 %v2621_v61 }
 0x119   :  { %1906 = vmatpush2.bf16.msra.mxu0 %v2616_v62 }
 0x11a   :  { %1947 = vmatpush2.bf16.msra.mxu1 %v2619_v63  ;;  %1907 = vmatprep.subr.bf16.mxu0 %v2624_v0  ;;  %v351_v63 = vsub.s32 2, %v342_v25  ;;  %v355_v0 = vsub.s32 3, %v342_v25 }
 0x11b   :  { %1948 = vmatprep.subr.bf16.mxu1 %v2627_v1 }
 0x11c   :  { %v352_v1 = vrot.slane %v339_v31, %v351_v63 }
 0x11d   :  { %1908 = vmatpush2.bf16.msra.mxu0 %v2622_v2  ;;  %v356_v2 = vrot.slane %v339_v31, %v355_v0 }
 0x11e   :  { %1949 = vmatpush2.bf16.msra.mxu1 %v2625_v3  ;;  %1909 = vmatprep.subr.bf16.mxu0 %v2630_v4 }
 0x11f   :  { %1950 = vmatprep.subr.bf16.mxu1 %v2633_v5 }
 0x121   :  { %1910 = vmatpush2.bf16.msra.mxu0 %v2628_v6 }
 0x122   :  { %1951 = vmatpush2.bf16.msra.mxu1 %v2631_v7  ;;  %1911 = vmatprep.subr.bf16.mxu0 %v2636_v10 }
 0x123   :  { %1952 = vmatprep.subr.bf16.mxu1 %v2639_v11 }
 0x125   :  { %1912 = vmatpush2.bf16.msra.mxu0 %v2634_v12 }
 0x126   :  { %1953 = vmatpush2.bf16.msra.mxu1 %v2637_v13  ;;  %1913 = vmatprep.subr.bf16.mxu0 %v2642_v14 }
 0x127   :  { %1954 = vmatprep.subr.bf16.mxu1 %v2645_v15 }
 0x129   :  { %1914 = vmatpush2.bf16.msra.mxu0 %v2640_v16 }
 0x12a   :  { %1955 = vmatpush2.bf16.msra.mxu1 %v2643_v17  ;;  %1915 = vmatprep.subr.bf16.mxu0 %v2648_v19 }
 0x12b   :  { %1956 = vmatprep.subr.bf16.mxu1 %v2651_v22 }
 0x12d   :  { %1916 = vmatpush2.bf16.msra.mxu0 %v2646_v23 }
 0x12e   :  { %1957 = vmatpush2.bf16.msra.mxu1 %v2649_v24  ;;  %1917 = vmatprep.subr.bf16.mxu0 %v2654_v26 }
 0x12f   :  { %1958 = vmatprep.subr.bf16.mxu1 %v2657_v27 }
 0x131   :  { %1918 = vmatpush2.bf16.msra.mxu0 %v2652_v28 }
 0x132   :  { %1959 = vmatpush2.bf16.msra.mxu1 %v2655_v29 }
 0x134   :  { %v1675_v35 = vpop.f32.mrf.mxu0  ;;  %1920 = vmatmul.mubr.bf16.vlgmr.msra.gmra.mxu0 %v2838_v20 }
 0x135   :  { %v1716_v36 = vpop.f32.mrf.mxu1  ;;  %1961 = vmatmul.mubr.bf16.vlgmr.msra.gmra.mxu1 %v2840_v21  ;;  %v1676_v38 = vadd.f32 %v1675_v35, %v344_v33  ;;  %v1986_v35 = vld [vmem:[#allocation8] sm:$0xff] }
 0x136   :  { %v1677_v8 = vpop.f32.mrf.mxu0 }
 0x137   :  { %v1718_v9 = vpop.f32.mrf.mxu1  ;;  %v1717_v39 = vadd.f32 %v1716_v36, %v1676_v38  ;;  %v1678_v49 = vadd.f32 %v1677_v8, %v348_v34 }
 0x138   :  { %v1679_v52 = vpop.f32.mrf.mxu0 }
 0x139   :  { %v1720_v41 = vpop.f32.mrf.mxu1  ;;  %v1719_v37 = vadd.f32 %v1718_v9, %v1678_v49 }
 0x13a   :  { %v1680_v40 = vpop.f32.mrf.mxu0 }
 0x13b   :  { %v1721_v42 = vpop.f32.mrf.mxu1 }
 0x174   :  { %v1757_v43 = vpop.f32.mrf.mxu0 }
 0x175   :  { %v1798_v44 = vpop.f32.mrf.mxu1  ;;  %v1758_v45 = vadd.f32 %v1757_v43, %v1717_v39 }
 0x176   :  { %v1759_v46 = vpop.f32.mrf.mxu0 }
 0x177   :  { %v1800_v47 = vpop.f32.mrf.mxu1  ;;  %v1799_v48 = vadd.f32 %v1798_v44, %v1758_v45  ;;  %v1760_v50 = vadd.f32 %v1759_v46, %v1719_v37 }
 0x178   :  { %v1761_v20 = vpop.f32.mrf.mxu0 }
 0x179   :  { %v1802_v51 = vpop.f32.mrf.mxu1  ;;  %v1801_v21 = vadd.f32 %v1800_v47, %v1760_v50 }
 0x17a   :  { %v1762_v53 = vpop.f32.mrf.mxu0 }
 0x17b   :  { %v1803_v54 = vpop.f32.mrf.mxu1 }
 0x1b4   :  { %v1839_v55 = vpop.f32.mrf.mxu0 }
 0x1b5   :  { %v1880_v56 = vpop.f32.mrf.mxu1  ;;  %v1840_v3 = vadd.f32 %v1839_v55, %v352_v1 }
 0x1b6   :  { %v1841_v57 = vpop.f32.mrf.mxu0 }
 0x1b7   :  { %v1882_v58 = vpop.f32.mrf.mxu1  ;;  %v1842_v4 = vadd.f32 %v1841_v57, %v356_v2  ;;  %v1881_v5 = vadd.f32 %v1880_v56, %v1840_v3 }
 0x1b8   :  { %v1843_v59 = vpop.f32.mrf.mxu0 }
 0x1b9   :  { %v1884_v60 = vpop.f32.mrf.mxu1  ;;  %v1883_v10 = vadd.f32 %v1882_v58, %v1842_v4 }
 0x1ba   :  { %v1844_v61 = vpop.f32.mrf.mxu0 }
 0x1bb   :  { %v1885_v62 = vpop.f32.mrf.mxu1 }
 0x1f4   :  { %v1921_v6 = vpop.f32.mrf.mxu0 }
 0x1f5   :  { %v1962_v7 = vpop.f32.mrf.mxu1  ;;  %v1922_v11 = vadd.f32 %v1921_v6, %v1881_v5 }
 0x1f6   :  { %v1923_v12 = vpop.f32.mrf.mxu0 }
 0x1f7   :  { %v1964_v13 = vpop.f32.mrf.mxu1  ;;  %v1963_v14 = vadd.f32 %v1962_v7, %v1922_v11  ;;  %v1924_v15 = vadd.f32 %v1923_v12, %v1883_v10 }
 0x1f8   :  { %v1925_v16 = vpop.f32.mrf.mxu0 }
 0x1f9   :  { %v1966_v17 = vpop.f32.mrf.mxu1  ;;  %v2265_v18 = vmul.f32 -1.442695, %v1963_v14  ;;  %v1965_v19 = vadd.f32 %v1964_v13, %v1924_v15 }
 0x1fa   :  { %v1926_v22 = vpop.f32.mrf.mxu0 }
 0x1fb   :  { %v1967_v23 = vpop.f32.mrf.mxu1  ;;  %2658 = vpow2.f32 %v2265_v18  ;;  %v2266_v24 = vmul.f32 -1.442695, %v1965_v19 }
 0x1fd   :  { %2660 = vpow2.f32 %v2266_v24 }
 0x208   :  { %v2659_v25 = vpop.eup %2658 }
 0x209   :  { %v1975_v26 = vadd.f32 1.0, %v2659_v25 }
 0x20a   :  { %v2661_v27 = vpop.eup %2660 }
 0x20b   :  { %2662 = vrcp.f32 %v1975_v26  ;;  %v1976_v28 = vadd.f32 1.0, %v2661_v27 }
 0x20d   :  { %2664 = vrcp.f32 %v1976_v28 }
 0x218   :  { %v2663_v29 = vpop.eup %2662 }
 0x219   :  { %v1981_v30 = vmul.f32 %v2663_v29, %v1799_v48 }
 0x21a   :  { %v2665_v31 = vpop.eup %2664 }
 0x21b   :  { %v1982_v32 = vmul.f32 %v2665_v31, %v1801_v21  ;;  %1990 = vst [vmem:[#allocation10 + $0x8] sm:$0xff] %v1981_v30 }
 0x21d   :  { %v1983_v33 = vmul.f32 0.5, %v1982_v32  ;;  %1991 = vst [vmem:[#allocation10 + $0x10] sm:$0xff] %v1982_v32 }
 0x21f   :  { %v1984_v34 = vmul.f32 1.442695, %v1983_v33 }
 0x221   :  { %2666 = vpow2.f32 %v1984_v34 }
 0x22e   :  { %v2667_v36 = vpop.eup %2666 }
 0x22f   :  { %v1987_v38 = vmul.f32 %v2667_v36, %v1986_v35 }
 0x231   :  { %v1988_v8 = vadd.f32 %v1987_v38, %v1981_v30 }
 0x233   :  { %1989 = vst [vmem:[#allocation10] sm:$0xff] %v1988_v8 }
 0x234   :  { %2759 = shalt.err (!%p2756_p10)
}
 0x235   :  { %2001 = dma.vmem_to_hbm [thread:$0]  %s1999_s3, 384, %s2859_s4, [#allocation4]  }
 0x236   :  { %2774 = dma.done.wait [#allocation4], 384  }
 0x237   :  { %2775 = vsyncadd [#allocation4], 4294966912 }
 0x238   :  { %2005 = vsyncpa [#allocation3], 1 }
 0x239   :  { %2006 = vsyncpa [#allocation6], 1 }
 0x23a   :  { %2007 = vsyncpa [#allocation9], 1 }
 0x23b   :  { %2008 = vsyncpa [#allocation4], 1 }

</bundles_post_ra>
